<compile_context>
chip_gen: v6e
topology: v6e:2x2x1
jax: 0.10.0
libtpu: 0.0.40
codegen_flags: <defaults>
</compile_context>

<pallas_src>
import functools

import numpy as np
import jax
import jax.numpy as jnp
from jax.experimental import pallas as pl
from jax.experimental.pallas import tpu as pltpu


_LANE = 128
# Below this many output bytes, launch + grid overhead dominates; use XLA.
_SMALL_FAST_PATH_BYTES = 256 * 1024
# Per-grid-step output block budget.  Output is double-buffered by the
# pipeline -> ~2x this resident, well inside v5e's 16 MiB scoped default and
# v7x's 32 MiB scoped / 64 MiB physical VMEM.
_MAX_BLOCK_BYTES = 2 * 1024 * 1024
# Cap on statically unrolled per-step DMA descriptors (compile time / misc
# slot pressure) for very narrow rows.
_MAX_BATCH_ROWS = 64


def _gather_kernel(g, b, s_tile, s_blocks, n_total, guard,
                   idx_ref, x_hbm, o_ref, sems):
    """Gather `b` rows of x (kept in HBM) directly into the output block.

    idx_ref : SMEM (n_pad,) int32        scalar-prefetched gather indices
    x_hbm   : ANY/HBM (P*G, S_tot, 128)  source rows (never auto-tiled)
    o_ref   : VMEM (1, b, s_tile, 128)   pipelined output block (DMA dst)
    sems    : DMA semaphores (b,)
    """
    p = pl.program_id(0)      # which prefix slab
    j = pl.program_id(1)      # which batch of indices
    r = pl.program_id(2)      # which sublane tile of the row (wide-row case)
    base = p * g

    # Build all descriptors first: every SMEM scalar read happens before any
    # .wait() (waits break sst->sld forwarding).
    copies = []
    for k in range(b):
        flat = j * b + k
        row = base + idx_ref[flat]
        if s_blocks > 1:
            src = x_hbm.at[row, pl.ds(r * s_tile, s_tile), :]
        else:
            src = x_hbm.at[row]
        cp = pltpu.make_async_copy(src, o_ref.at[0, k], sems.at[k])
        copies.append((cp, flat))

    # Issue all row DMAs first so the random-row HBM fetches are in flight
    # simultaneously, then wait.  Padded index slots are skipped.
    for cp, flat in copies:
        if guard:
            @pl.when(flat < n_total)
            def _(cp=cp):
                cp.start()
        else:
            cp.start()
    for cp, flat in copies:
        if guard:
            @pl.when(flat < n_total)
            def _(cp=cp):
                cp.wait()
        else:
            cp.wait()


def gather_v2(x, dim, idx, *, force_pallas=False,
              max_block_bytes=_MAX_BLOCK_BYTES):
    """JAX/Pallas equivalent of GatherV2Net.forward(x, dim, idx)."""
    x = jnp.asarray(x)
    dim = dim % x.ndim
    idx = jnp.asarray(idx).astype(jnp.int32)
    n = int(idx.shape[0])

    g = int(x.shape[dim])
    prefix_dims = tuple(x.shape[:dim])
    suffix_dims = tuple(x.shape[dim + 1:])
    prefix = int(np.prod(prefix_dims)) if prefix_dims else 1
    suffix = int(np.prod(suffix_dims)) if suffix_dims else 1

    itemsize = jnp.dtype(x.dtype).itemsize
    out_bytes = n * prefix * suffix * itemsize

    # Small-problem fast path (and degenerate n == 0).
    if n == 0 or (not force_pallas and out_bytes < _SMALL_FAST_PATH_BYTES):
        return jnp.take(x, idx, axis=dim)

    # Clamp instead of erroring on out-of-range indices (see header note).
    idx = jnp.clip(idx, 0, g - 1)

    # ---- canonical lane-dense row layout -------------------------------------
    if suffix >= _LANE:
        # No-transpose layout: pure reshape, gathered flat row = p*G + idx.
        p_sz, row = prefix, suffix
        x_rows = x.reshape(prefix * g, row)
        post = "prefix"      # result comes back as (prefix, n, suffix)
    else:
        # Gather axis narrow: one transpose so the remaining dims form a
        # lane-dense row.
        p_sz = 1
        row = prefix * suffix
        x_rows = jnp.moveaxis(x, dim, 0).reshape(g, row)
        post = "front"       # result comes back as (n, rest...) -> moveaxis

    # Lane-dense output: pad the row to a multiple of 128 lanes so output
    # stores are unmasked vst; padding is sliced off after the kernel.
    row_pad = int(pl.cdiv(row, _LANE)) * _LANE
    s_sz = row_pad // _LANE
    block_row_bytes = row_pad * itemsize

    if block_row_bytes <= max_block_bytes:
        # Normal case: batch several rows per grid step.
        s_tile, s_blocks = s_sz, 1
        b = max(1, max_block_bytes // block_row_bytes)
        b = int(min(b, n, _MAX_BATCH_ROWS))
    else:
        # Wide rows: tile the sublane (row) axis with a third grid dimension
        # so each block stays within budget and pipelining is preserved.
        b = 1
        s_tile = max(8, (max_block_bytes // (_LANE * itemsize)) // 8 * 8)
        s_tile = int(min(s_tile, s_sz))
        s_blocks = int(pl.cdiv(s_sz, s_tile))

    s_tot = s_tile * s_blocks
    row_tot = s_tot * _LANE
    if row_tot != row:
        x_rows = jnp.pad(x_rows, ((0, 0), (0, row_tot - row)))
    x3 = x_rows.reshape(p_sz * g, s_tot, _LANE)

    n_pad = int(pl.cdiv(n, b)) * b
    if n_pad != n:
        idx = jnp.concatenate([idx, jnp.zeros((n_pad - n,), jnp.int32)])
    guard = n_pad != n          # only gate DMAs when there are padded slots

    out4 = pl.pallas_call(
        functools.partial(_gather_kernel, g, b, s_tile, s_blocks, n, guard),
        out_shape=jax.ShapeDtypeStruct((p_sz, n_pad, s_tot, _LANE), x.dtype),
        grid_spec=pltpu.PrefetchScalarGridSpec(
            num_scalar_prefetch=1,
            grid=(p_sz, n_pad // b, s_blocks),
            in_specs=[pl.BlockSpec(memory_space=pl.ANY)],
            out_specs=pl.BlockSpec(
                (1, b, s_tile, _LANE),
                lambda p, j, r, idx_ref: (p, j, r, 0)),
            scratch_shapes=[pltpu.SemaphoreType.DMA((b,))],
        ),
        compiler_params=pltpu.CompilerParams(
            # All grid axes are independent.  On v7x consider CORE_PARALLEL
            # on the index-batch axis if xprof shows one TC idle.
            dimension_semantics=("parallel", "parallel", "parallel"),
            vmem_limit_bytes=32 * 1024 * 1024,
        ),
    )(idx, x3)

    out_rows = out4.reshape(p_sz, n_pad, row_tot)[:, :n, :row]
    if post == "prefix":
        return out_rows.reshape(prefix_dims + (n,) + suffix_dims)
    rest = prefix_dims + suffix_dims
    return jnp.moveaxis(out_rows.reshape((n,) + rest), 0, dim)


if __name__ == "__main__":
    key = jax.random.PRNGKey(0)
    kx, ki = jax.random.split(key)

    # 1) Shapes consistent with the test network: NCHW tensor, gather along H.
    x = jax.random.normal(kx, (2, 4, 16, 16), dtype=jnp.float32)
    dim = 2
    idx = jax.random.randint(ki, (8,), 0, x.shape[dim], dtype=jnp.int32)
    out = jax.block_until_ready(gather_v2(x, dim, idx, force_pallas=True))
    ref = jnp.take(x, idx, axis=dim)
    assert out.shape == ref.shape and out.dtype == ref.dtype
    np.testing.assert_allclose(np.asarray(out), np.asarray(ref), rtol=0, atol=0)

    # 2) No-transpose layout: gather along channels with a wide (>=128) suffix.
    x2 = jax.random.normal(kx, (2, 8, 4, 64), dtype=jnp.float32)
    idx2 = jax.random.randint(ki, (6,), 0, x2.shape[1], dtype=jnp.int32)
    out2 = jax.block_until_ready(gather_v2(x2, 1, idx2, force_pallas=True))
    np.testing.assert_allclose(
        np.asarray(out2), np.asarray(jnp.take(x2, idx2, axis=1)), rtol=0, atol=0)

    # 3) Lane-padding path: row length not a multiple of 128.
    x3 = jax.random.normal(kx, (4, 10, 48), dtype=jnp.float32)
    idx3 = jax.random.randint(ki, (16,), 0, x3.shape[1], dtype=jnp.int32)
    out3 = jax.block_until_ready(gather_v2(x3, 1, idx3, force_pallas=True))
    np.testing.assert_allclose(
        np.asarray(out3), np.asarray(jnp.take(x3, idx3, axis=1)), rtol=0, atol=0)

    # 4) Wide-row sublane tiling path (exercised via a tiny block budget).
    x4 = jax.random.normal(kx, (3, 6, 8, 256), dtype=jnp.float32)
    idx4 = jax.random.randint(ki, (5,), 0, x4.shape[1], dtype=jnp.int32)
    out4 = jax.block_until_ready(
        gather_v2(x4, 1, idx4, force_pallas=True, max_block_bytes=4096))
    np.testing.assert_allclose(
        np.asarray(out4), np.asarray(jnp.take(x4, idx4, axis=1)), rtol=0, atol=0)

    # 5) Guarded padded-index path (n not a multiple of b) + multi-step grid.
    x5 = jax.random.normal(kx, (2, 40, 4, 64), dtype=jnp.float32)
    idx5 = jax.random.randint(ki, (10,), 0, x5.shape[1], dtype=jnp.int32)
    out5 = jax.block_until_ready(
        gather_v2(x5, 1, idx5, force_pallas=True, max_block_bytes=4096))
    np.testing.assert_allclose(
        np.asarray(out5), np.asarray(jnp.take(x5, idx5, axis=1)), rtol=0, atol=0)

    # 6) Default small-problem fast path still matches.
    out6 = jax.block_until_ready(gather_v2(x, dim, idx))
    np.testing.assert_allclose(np.asarray(out6), np.asarray(ref), rtol=0, atol=0)

    print("KERNEL_OK")
</pallas_src>

<mosaic_0001>
module attributes {stable_mosaic.version = 11 : i64} {
  func.func @_gather_kernel(%arg0: i32, %arg1: i32, %arg2: i32, %arg3: memref<8xi32, #tpu.memory_space<smem>>, %arg4: memref<16x1x128xf32, #tpu.memory_space<any>>, %arg5: memref<1x8x1x128xf32, #tpu.memory_space<vmem>>, %arg6: memref<8x!tpu.dma_semaphore, #tpu.memory_space<semaphore_mem>>) attributes {dimension_semantics = [#tpu.dimension_semantics<parallel>, #tpu.dimension_semantics<parallel>, #tpu.dimension_semantics<parallel>], iteration_bounds = array<i64: 1, 1, 1>, scalar_prefetch = 1 : i64, scratch_operands = 1 : i64, tpu.core_type = #tpu.core_type<tc>, window_params = [{}, {transform_indices = @transform_1, window_bounds = array<i64: 1, 8, 1, 128>}]} {
    %c16_i32 = arith.constant 16 : i32
    %0 = arith.muli %arg0, %c16_i32 : i32
    %c8_i32 = arith.constant 8 : i32
    %1 = arith.muli %arg1, %c8_i32 : i32
    %c0_i32 = arith.constant 0 : i32
    %2 = arith.addi %1, %c0_i32 : i32
    %3 = arith.index_cast %2 : i32 to index
    %4 = memref.load %arg3[%3] : memref<8xi32, #tpu.memory_space<smem>>
    %5 = arith.addi %0, %4 : i32
    %c8_i32_0 = arith.constant 8 : i32
    %6 = arith.muli %arg1, %c8_i32_0 : i32
    %c1_i32 = arith.constant 1 : i32
    %7 = arith.addi %6, %c1_i32 : i32
    %8 = arith.index_cast %7 : i32 to index
    %9 = memref.load %arg3[%8] : memref<8xi32, #tpu.memory_space<smem>>
    %10 = arith.addi %0, %9 : i32
    %c8_i32_1 = arith.constant 8 : i32
    %11 = arith.muli %arg1, %c8_i32_1 : i32
    %c2_i32 = arith.constant 2 : i32
    %12 = arith.addi %11, %c2_i32 : i32
    %13 = arith.index_cast %12 : i32 to index
    %14 = memref.load %arg3[%13] : memref<8xi32, #tpu.memory_space<smem>>
    %15 = arith.addi %0, %14 : i32
    %c8_i32_2 = arith.constant 8 : i32
    %16 = arith.muli %arg1, %c8_i32_2 : i32
    %c3_i32 = arith.constant 3 : i32
    %17 = arith.addi %16, %c3_i32 : i32
    %18 = arith.index_cast %17 : i32 to index
    %19 = memref.load %arg3[%18] : memref<8xi32, #tpu.memory_space<smem>>
    %20 = arith.addi %0, %19 : i32
    %c8_i32_3 = arith.constant 8 : i32
    %21 = arith.muli %arg1, %c8_i32_3 : i32
    %c4_i32 = arith.constant 4 : i32
    %22 = arith.addi %21, %c4_i32 : i32
    %23 = arith.index_cast %22 : i32 to index
    %24 = memref.load %arg3[%23] : memref<8xi32, #tpu.memory_space<smem>>
    %25 = arith.addi %0, %24 : i32
    %c8_i32_4 = arith.constant 8 : i32
    %26 = arith.muli %arg1, %c8_i32_4 : i32
    %c5_i32 = arith.constant 5 : i32
    %27 = arith.addi %26, %c5_i32 : i32
    %28 = arith.index_cast %27 : i32 to index
    %29 = memref.load %arg3[%28] : memref<8xi32, #tpu.memory_space<smem>>
    %30 = arith.addi %0, %29 : i32
    %c8_i32_5 = arith.constant 8 : i32
    %31 = arith.muli %arg1, %c8_i32_5 : i32
    %c6_i32 = arith.constant 6 : i32
    %32 = arith.addi %31, %c6_i32 : i32
    %33 = arith.index_cast %32 : i32 to index
    %34 = memref.load %arg3[%33] : memref<8xi32, #tpu.memory_space<smem>>
    %35 = arith.addi %0, %34 : i32
    %c8_i32_6 = arith.constant 8 : i32
    %36 = arith.muli %arg1, %c8_i32_6 : i32
    %c7_i32 = arith.constant 7 : i32
    %37 = arith.addi %36, %c7_i32 : i32
    %38 = arith.index_cast %37 : i32 to index
    %39 = memref.load %arg3[%38] : memref<8xi32, #tpu.memory_space<smem>>
    %40 = arith.addi %0, %39 : i32
    %c0_i32_7 = arith.constant 0 : i32
    %c0_i32_8 = arith.constant 0 : i32
    %c0_i32_9 = arith.constant 0 : i32
    %c0_i32_10 = arith.constant 0 : i32
    %c0_i32_11 = arith.constant 0 : i32
    %41 = tpu.memref_slice %arg4[%5, %c0_i32_10, %c0_i32_11] : memref<16x1x128xf32, #tpu.memory_space<any>> -> memref<1x1x128xf32, #tpu.memory_space<any>>
    %42 = tpu.memref_squeeze %41 : memref<1x1x128xf32, #tpu.memory_space<any>> -> memref<1x128xf32, #tpu.memory_space<any>>
    %c0_i32_12 = arith.constant 0 : i32
    %c0_i32_13 = arith.constant 0 : i32
    %43 = tpu.memref_slice %arg5[%c0_i32_7, %c0_i32_8, %c0_i32_12, %c0_i32_13] : memref<1x8x1x128xf32, #tpu.memory_space<vmem>> -> memref<1x1x1x128xf32, #tpu.memory_space<vmem>>
    %44 = tpu.memref_squeeze %43 : memref<1x1x1x128xf32, #tpu.memory_space<vmem>> -> memref<1x128xf32, #tpu.memory_space<vmem>>
    %45 = tpu.memref_slice %arg6[%c0_i32_9] : memref<8x!tpu.dma_semaphore, #tpu.memory_space<semaphore_mem>> -> memref<1x!tpu.dma_semaphore, #tpu.memory_space<semaphore_mem>>
    %46 = tpu.memref_squeeze %45 : memref<1x!tpu.dma_semaphore, #tpu.memory_space<semaphore_mem>> -> memref<!tpu.dma_semaphore, #tpu.memory_space<semaphore_mem>>
    tpu.enqueue_dma source(%42 : memref<1x128xf32, #tpu.memory_space<any>>) target(%44 : memref<1x128xf32, #tpu.memory_space<vmem>>) target_semaphore(%46 : memref<!tpu.dma_semaphore, #tpu.memory_space<semaphore_mem>>)
    %c0_i32_14 = arith.constant 0 : i32
    %c1_i32_15 = arith.constant 1 : i32
    %c1_i32_16 = arith.constant 1 : i32
    %c0_i32_17 = arith.constant 0 : i32
    %c0_i32_18 = arith.constant 0 : i32
    %47 = tpu.memref_slice %arg4[%10, %c0_i32_17, %c0_i32_18] : memref<16x1x128xf32, #tpu.memory_space<any>> -> memref<1x1x128xf32, #tpu.memory_space<any>>
    %48 = tpu.memref_squeeze %47 : memref<1x1x128xf32, #tpu.memory_space<any>> -> memref<1x128xf32, #tpu.memory_space<any>>
    %c0_i32_19 = arith.constant 0 : i32
    %c0_i32_20 = arith.constant 0 : i32
    %49 = tpu.memref_slice %arg5[%c0_i32_14, %c1_i32_15, %c0_i32_19, %c0_i32_20] : memref<1x8x1x128xf32, #tpu.memory_space<vmem>> -> memref<1x1x1x128xf32, #tpu.memory_space<vmem>>
    %50 = tpu.memref_squeeze %49 : memref<1x1x1x128xf32, #tpu.memory_space<vmem>> -> memref<1x128xf32, #tpu.memory_space<vmem>>
    %51 = tpu.memref_slice %arg6[%c1_i32_16] : memref<8x!tpu.dma_semaphore, #tpu.memory_space<semaphore_mem>> -> memref<1x!tpu.dma_semaphore, #tpu.memory_space<semaphore_mem>>
    %52 = tpu.memref_squeeze %51 : memref<1x!tpu.dma_semaphore, #tpu.memory_space<semaphore_mem>> -> memref<!tpu.dma_semaphore, #tpu.memory_space<semaphore_mem>>
    tpu.enqueue_dma source(%48 : memref<1x128xf32, #tpu.memory_space<any>>) target(%50 : memref<1x128xf32, #tpu.memory_space<vmem>>) target_semaphore(%52 : memref<!tpu.dma_semaphore, #tpu.memory_space<semaphore_mem>>)
    %c0_i32_21 = arith.constant 0 : i32
    %c2_i32_22 = arith.constant 2 : i32
    %c2_i32_23 = arith.constant 2 : i32
    %c0_i32_24 = arith.constant 0 : i32
    %c0_i32_25 = arith.constant 0 : i32
    %53 = tpu.memref_slice %arg4[%15, %c0_i32_24, %c0_i32_25] : memref<16x1x128xf32, #tpu.memory_space<any>> -> memref<1x1x128xf32, #tpu.memory_space<any>>
    %54 = tpu.memref_squeeze %53 : memref<1x1x128xf32, #tpu.memory_space<any>> -> memref<1x128xf32, #tpu.memory_space<any>>
    %c0_i32_26 = arith.constant 0 : i32
    %c0_i32_27 = arith.constant 0 : i32
    %55 = tpu.memref_slice %arg5[%c0_i32_21, %c2_i32_22, %c0_i32_26, %c0_i32_27] : memref<1x8x1x128xf32, #tpu.memory_space<vmem>> -> memref<1x1x1x128xf32, #tpu.memory_space<vmem>>
    %56 = tpu.memref_squeeze %55 : memref<1x1x1x128xf32, #tpu.memory_space<vmem>> -> memref<1x128xf32, #tpu.memory_space<vmem>>
    %57 = tpu.memref_slice %arg6[%c2_i32_23] : memref<8x!tpu.dma_semaphore, #tpu.memory_space<semaphore_mem>> -> memref<1x!tpu.dma_semaphore, #tpu.memory_space<semaphore_mem>>
    %58 = tpu.memref_squeeze %57 : memref<1x!tpu.dma_semaphore, #tpu.memory_space<semaphore_mem>> -> memref<!tpu.dma_semaphore, #tpu.memory_space<semaphore_mem>>
    tpu.enqueue_dma source(%54 : memref<1x128xf32, #tpu.memory_space<any>>) target(%56 : memref<1x128xf32, #tpu.memory_space<vmem>>) target_semaphore(%58 : memref<!tpu.dma_semaphore, #tpu.memory_space<semaphore_mem>>)
    %c0_i32_28 = arith.constant 0 : i32
    %c3_i32_29 = arith.constant 3 : i32
    %c3_i32_30 = arith.constant 3 : i32
    %c0_i32_31 = arith.constant 0 : i32
    %c0_i32_32 = arith.constant 0 : i32
    %59 = tpu.memref_slice %arg4[%20, %c0_i32_31, %c0_i32_32] : memref<16x1x128xf32, #tpu.memory_space<any>> -> memref<1x1x128xf32, #tpu.memory_space<any>>
    %60 = tpu.memref_squeeze %59 : memref<1x1x128xf32, #tpu.memory_space<any>> -> memref<1x128xf32, #tpu.memory_space<any>>
    %c0_i32_33 = arith.constant 0 : i32
    %c0_i32_34 = arith.constant 0 : i32
    %61 = tpu.memref_slice %arg5[%c0_i32_28, %c3_i32_29, %c0_i32_33, %c0_i32_34] : memref<1x8x1x128xf32, #tpu.memory_space<vmem>> -> memref<1x1x1x128xf32, #tpu.memory_space<vmem>>
    %62 = tpu.memref_squeeze %61 : memref<1x1x1x128xf32, #tpu.memory_space<vmem>> -> memref<1x128xf32, #tpu.memory_space<vmem>>
    %63 = tpu.memref_slice %arg6[%c3_i32_30] : memref<8x!tpu.dma_semaphore, #tpu.memory_space<semaphore_mem>> -> memref<1x!tpu.dma_semaphore, #tpu.memory_space<semaphore_mem>>
    %64 = tpu.memref_squeeze %63 : memref<1x!tpu.dma_semaphore, #tpu.memory_space<semaphore_mem>> -> memref<!tpu.dma_semaphore, #tpu.memory_space<semaphore_mem>>
    tpu.enqueue_dma source(%60 : memref<1x128xf32, #tpu.memory_space<any>>) target(%62 : memref<1x128xf32, #tpu.memory_space<vmem>>) target_semaphore(%64 : memref<!tpu.dma_semaphore, #tpu.memory_space<semaphore_mem>>)
    %c0_i32_35 = arith.constant 0 : i32
    %c4_i32_36 = arith.constant 4 : i32
    %c4_i32_37 = arith.constant 4 : i32
    %c0_i32_38 = arith.constant 0 : i32
    %c0_i32_39 = arith.constant 0 : i32
    %65 = tpu.memref_slice %arg4[%25, %c0_i32_38, %c0_i32_39] : memref<16x1x128xf32, #tpu.memory_space<any>> -> memref<1x1x128xf32, #tpu.memory_space<any>>
    %66 = tpu.memref_squeeze %65 : memref<1x1x128xf32, #tpu.memory_space<any>> -> memref<1x128xf32, #tpu.memory_space<any>>
    %c0_i32_40 = arith.constant 0 : i32
    %c0_i32_41 = arith.constant 0 : i32
    %67 = tpu.memref_slice %arg5[%c0_i32_35, %c4_i32_36, %c0_i32_40, %c0_i32_41] : memref<1x8x1x128xf32, #tpu.memory_space<vmem>> -> memref<1x1x1x128xf32, #tpu.memory_space<vmem>>
    %68 = tpu.memref_squeeze %67 : memref<1x1x1x128xf32, #tpu.memory_space<vmem>> -> memref<1x128xf32, #tpu.memory_space<vmem>>
    %69 = tpu.memref_slice %arg6[%c4_i32_37] : memref<8x!tpu.dma_semaphore, #tpu.memory_space<semaphore_mem>> -> memref<1x!tpu.dma_semaphore, #tpu.memory_space<semaphore_mem>>
    %70 = tpu.memref_squeeze %69 : memref<1x!tpu.dma_semaphore, #tpu.memory_space<semaphore_mem>> -> memref<!tpu.dma_semaphore, #tpu.memory_space<semaphore_mem>>
    tpu.enqueue_dma source(%66 : memref<1x128xf32, #tpu.memory_space<any>>) target(%68 : memref<1x128xf32, #tpu.memory_space<vmem>>) target_semaphore(%70 : memref<!tpu.dma_semaphore, #tpu.memory_space<semaphore_mem>>)
    %c0_i32_42 = arith.constant 0 : i32
    %c5_i32_43 = arith.constant 5 : i32
    %c5_i32_44 = arith.constant 5 : i32
    %c0_i32_45 = arith.constant 0 : i32
    %c0_i32_46 = arith.constant 0 : i32
    %71 = tpu.memref_slice %arg4[%30, %c0_i32_45, %c0_i32_46] : memref<16x1x128xf32, #tpu.memory_space<any>> -> memref<1x1x128xf32, #tpu.memory_space<any>>
    %72 = tpu.memref_squeeze %71 : memref<1x1x128xf32, #tpu.memory_space<any>> -> memref<1x128xf32, #tpu.memory_space<any>>
    %c0_i32_47 = arith.constant 0 : i32
    %c0_i32_48 = arith.constant 0 : i32
    %73 = tpu.memref_slice %arg5[%c0_i32_42, %c5_i32_43, %c0_i32_47, %c0_i32_48] : memref<1x8x1x128xf32, #tpu.memory_space<vmem>> -> memref<1x1x1x128xf32, #tpu.memory_space<vmem>>
    %74 = tpu.memref_squeeze %73 : memref<1x1x1x128xf32, #tpu.memory_space<vmem>> -> memref<1x128xf32, #tpu.memory_space<vmem>>
    %75 = tpu.memref_slice %arg6[%c5_i32_44] : memref<8x!tpu.dma_semaphore, #tpu.memory_space<semaphore_mem>> -> memref<1x!tpu.dma_semaphore, #tpu.memory_space<semaphore_mem>>
    %76 = tpu.memref_squeeze %75 : memref<1x!tpu.dma_semaphore, #tpu.memory_space<semaphore_mem>> -> memref<!tpu.dma_semaphore, #tpu.memory_space<semaphore_mem>>
    tpu.enqueue_dma source(%72 : memref<1x128xf32, #tpu.memory_space<any>>) target(%74 : memref<1x128xf32, #tpu.memory_space<vmem>>) target_semaphore(%76 : memref<!tpu.dma_semaphore, #tpu.memory_space<semaphore_mem>>)
    %c0_i32_49 = arith.constant 0 : i32
    %c6_i32_50 = arith.constant 6 : i32
    %c6_i32_51 = arith.constant 6 : i32
    %c0_i32_52 = arith.constant 0 : i32
    %c0_i32_53 = arith.constant 0 : i32
    %77 = tpu.memref_slice %arg4[%35, %c0_i32_52, %c0_i32_53] : memref<16x1x128xf32, #tpu.memory_space<any>> -> memref<1x1x128xf32, #tpu.memory_space<any>>
    %78 = tpu.memref_squeeze %77 : memref<1x1x128xf32, #tpu.memory_space<any>> -> memref<1x128xf32, #tpu.memory_space<any>>
    %c0_i32_54 = arith.constant 0 : i32
    %c0_i32_55 = arith.constant 0 : i32
    %79 = tpu.memref_slice %arg5[%c0_i32_49, %c6_i32_50, %c0_i32_54, %c0_i32_55] : memref<1x8x1x128xf32, #tpu.memory_space<vmem>> -> memref<1x1x1x128xf32, #tpu.memory_space<vmem>>
    %80 = tpu.memref_squeeze %79 : memref<1x1x1x128xf32, #tpu.memory_space<vmem>> -> memref<1x128xf32, #tpu.memory_space<vmem>>
    %81 = tpu.memref_slice %arg6[%c6_i32_51] : memref<8x!tpu.dma_semaphore, #tpu.memory_space<semaphore_mem>> -> memref<1x!tpu.dma_semaphore, #tpu.memory_space<semaphore_mem>>
    %82 = tpu.memref_squeeze %81 : memref<1x!tpu.dma_semaphore, #tpu.memory_space<semaphore_mem>> -> memref<!tpu.dma_semaphore, #tpu.memory_space<semaphore_mem>>
    tpu.enqueue_dma source(%78 : memref<1x128xf32, #tpu.memory_space<any>>) target(%80 : memref<1x128xf32, #tpu.memory_space<vmem>>) target_semaphore(%82 : memref<!tpu.dma_semaphore, #tpu.memory_space<semaphore_mem>>)
    %c0_i32_56 = arith.constant 0 : i32
    %c7_i32_57 = arith.constant 7 : i32
    %c7_i32_58 = arith.constant 7 : i32
    %c0_i32_59 = arith.constant 0 : i32
    %c0_i32_60 = arith.constant 0 : i32
    %83 = tpu.memref_slice %arg4[%40, %c0_i32_59, %c0_i32_60] : memref<16x1x128xf32, #tpu.memory_space<any>> -> memref<1x1x128xf32, #tpu.memory_space<any>>
    %84 = tpu.memref_squeeze %83 : memref<1x1x128xf32, #tpu.memory_space<any>> -> memref<1x128xf32, #tpu.memory_space<any>>
    %c0_i32_61 = arith.constant 0 : i32
    %c0_i32_62 = arith.constant 0 : i32
    %85 = tpu.memref_slice %arg5[%c0_i32_56, %c7_i32_57, %c0_i32_61, %c0_i32_62] : memref<1x8x1x128xf32, #tpu.memory_space<vmem>> -> memref<1x1x1x128xf32, #tpu.memory_space<vmem>>
    %86 = tpu.memref_squeeze %85 : memref<1x1x1x128xf32, #tpu.memory_space<vmem>> -> memref<1x128xf32, #tpu.memory_space<vmem>>
    %87 = tpu.memref_slice %arg6[%c7_i32_58] : memref<8x!tpu.dma_semaphore, #tpu.memory_space<semaphore_mem>> -> memref<1x!tpu.dma_semaphore, #tpu.memory_space<semaphore_mem>>
    %88 = tpu.memref_squeeze %87 : memref<1x!tpu.dma_semaphore, #tpu.memory_space<semaphore_mem>> -> memref<!tpu.dma_semaphore, #tpu.memory_space<semaphore_mem>>
    tpu.enqueue_dma source(%84 : memref<1x128xf32, #tpu.memory_space<any>>) target(%86 : memref<1x128xf32, #tpu.memory_space<vmem>>) target_semaphore(%88 : memref<!tpu.dma_semaphore, #tpu.memory_space<semaphore_mem>>)
    %c0_i32_63 = arith.constant 0 : i32
    %c0_i32_64 = arith.constant 0 : i32
    %c0_i32_65 = arith.constant 0 : i32
    %c0_i32_66 = arith.constant 0 : i32
    %c0_i32_67 = arith.constant 0 : i32
    %89 = tpu.memref_slice %arg4[%5, %c0_i32_66, %c0_i32_67] : memref<16x1x128xf32, #tpu.memory_space<any>> -> memref<1x1x128xf32, #tpu.memory_space<any>>
    %90 = tpu.memref_squeeze %89 : memref<1x1x128xf32, #tpu.memory_space<any>> -> memref<1x128xf32, #tpu.memory_space<any>>
    %c0_i32_68 = arith.constant 0 : i32
    %c0_i32_69 = arith.constant 0 : i32
    %91 = tpu.memref_slice %arg5[%c0_i32_63, %c0_i32_64, %c0_i32_68, %c0_i32_69] : memref<1x8x1x128xf32, #tpu.memory_space<vmem>> -> memref<1x1x1x128xf32, #tpu.memory_space<vmem>>
    %92 = tpu.memref_squeeze %91 : memref<1x1x1x128xf32, #tpu.memory_space<vmem>> -> memref<1x128xf32, #tpu.memory_space<vmem>>
    %93 = tpu.memref_slice %arg6[%c0_i32_65] : memref<8x!tpu.dma_semaphore, #tpu.memory_space<semaphore_mem>> -> memref<1x!tpu.dma_semaphore, #tpu.memory_space<semaphore_mem>>
    %94 = tpu.memref_squeeze %93 : memref<1x!tpu.dma_semaphore, #tpu.memory_space<semaphore_mem>> -> memref<!tpu.dma_semaphore, #tpu.memory_space<semaphore_mem>>
    tpu.wait_dma2 semaphore(%94 : memref<!tpu.dma_semaphore, #tpu.memory_space<semaphore_mem>>) src(%90 : memref<1x128xf32, #tpu.memory_space<any>>) dst(%92 : memref<1x128xf32, #tpu.memory_space<vmem>>)
    %c0_i32_70 = arith.constant 0 : i32
    %c1_i32_71 = arith.constant 1 : i32
    %c1_i32_72 = arith.constant 1 : i32
    %c0_i32_73 = arith.constant 0 : i32
    %c0_i32_74 = arith.constant 0 : i32
    %95 = tpu.memref_slice %arg4[%10, %c0_i32_73, %c0_i32_74] : memref<16x1x128xf32, #tpu.memory_space<any>> -> memref<1x1x128xf32, #tpu.memory_space<any>>
    %96 = tpu.memref_squeeze %95 : memref<1x1x128xf32, #tpu.memory_space<any>> -> memref<1x128xf32, #tpu.memory_space<any>>
    %c0_i32_75 = arith.constant 0 : i32
    %c0_i32_76 = arith.constant 0 : i32
    %97 = tpu.memref_slice %arg5[%c0_i32_70, %c1_i32_71, %c0_i32_75, %c0_i32_76] : memref<1x8x1x128xf32, #tpu.memory_space<vmem>> -> memref<1x1x1x128xf32, #tpu.memory_space<vmem>>
    %98 = tpu.memref_squeeze %97 : memref<1x1x1x128xf32, #tpu.memory_space<vmem>> -> memref<1x128xf32, #tpu.memory_space<vmem>>
    %99 = tpu.memref_slice %arg6[%c1_i32_72] : memref<8x!tpu.dma_semaphore, #tpu.memory_space<semaphore_mem>> -> memref<1x!tpu.dma_semaphore, #tpu.memory_space<semaphore_mem>>
    %100 = tpu.memref_squeeze %99 : memref<1x!tpu.dma_semaphore, #tpu.memory_space<semaphore_mem>> -> memref<!tpu.dma_semaphore, #tpu.memory_space<semaphore_mem>>
    tpu.wait_dma2 semaphore(%100 : memref<!tpu.dma_semaphore, #tpu.memory_space<semaphore_mem>>) src(%96 : memref<1x128xf32, #tpu.memory_space<any>>) dst(%98 : memref<1x128xf32, #tpu.memory_space<vmem>>)
    %c0_i32_77 = arith.constant 0 : i32
    %c2_i32_78 = arith.constant 2 : i32
    %c2_i32_79 = arith.constant 2 : i32
    %c0_i32_80 = arith.constant 0 : i32
    %c0_i32_81 = arith.constant 0 : i32
    %101 = tpu.memref_slice %arg4[%15, %c0_i32_80, %c0_i32_81] : memref<16x1x128xf32, #tpu.memory_space<any>> -> memref<1x1x128xf32, #tpu.memory_space<any>>
    %102 = tpu.memref_squeeze %101 : memref<1x1x128xf32, #tpu.memory_space<any>> -> memref<1x128xf32, #tpu.memory_space<any>>
    %c0_i32_82 = arith.constant 0 : i32
    %c0_i32_83 = arith.constant 0 : i32
    %103 = tpu.memref_slice %arg5[%c0_i32_77, %c2_i32_78, %c0_i32_82, %c0_i32_83] : memref<1x8x1x128xf32, #tpu.memory_space<vmem>> -> memref<1x1x1x128xf32, #tpu.memory_space<vmem>>
    %104 = tpu.memref_squeeze %103 : memref<1x1x1x128xf32, #tpu.memory_space<vmem>> -> memref<1x128xf32, #tpu.memory_space<vmem>>
    %105 = tpu.memref_slice %arg6[%c2_i32_79] : memref<8x!tpu.dma_semaphore, #tpu.memory_space<semaphore_mem>> -> memref<1x!tpu.dma_semaphore, #tpu.memory_space<semaphore_mem>>
    %106 = tpu.memref_squeeze %105 : memref<1x!tpu.dma_semaphore, #tpu.memory_space<semaphore_mem>> -> memref<!tpu.dma_semaphore, #tpu.memory_space<semaphore_mem>>
    tpu.wait_dma2 semaphore(%106 : memref<!tpu.dma_semaphore, #tpu.memory_space<semaphore_mem>>) src(%102 : memref<1x128xf32, #tpu.memory_space<any>>) dst(%104 : memref<1x128xf32, #tpu.memory_space<vmem>>)
    %c0_i32_84 = arith.constant 0 : i32
    %c3_i32_85 = arith.constant 3 : i32
    %c3_i32_86 = arith.constant 3 : i32
    %c0_i32_87 = arith.constant 0 : i32
    %c0_i32_88 = arith.constant 0 : i32
    %107 = tpu.memref_slice %arg4[%20, %c0_i32_87, %c0_i32_88] : memref<16x1x128xf32, #tpu.memory_space<any>> -> memref<1x1x128xf32, #tpu.memory_space<any>>
    %108 = tpu.memref_squeeze %107 : memref<1x1x128xf32, #tpu.memory_space<any>> -> memref<1x128xf32, #tpu.memory_space<any>>
    %c0_i32_89 = arith.constant 0 : i32
    %c0_i32_90 = arith.constant 0 : i32
    %109 = tpu.memref_slice %arg5[%c0_i32_84, %c3_i32_85, %c0_i32_89, %c0_i32_90] : memref<1x8x1x128xf32, #tpu.memory_space<vmem>> -> memref<1x1x1x128xf32, #tpu.memory_space<vmem>>
    %110 = tpu.memref_squeeze %109 : memref<1x1x1x128xf32, #tpu.memory_space<vmem>> -> memref<1x128xf32, #tpu.memory_space<vmem>>
    %111 = tpu.memref_slice %arg6[%c3_i32_86] : memref<8x!tpu.dma_semaphore, #tpu.memory_space<semaphore_mem>> -> memref<1x!tpu.dma_semaphore, #tpu.memory_space<semaphore_mem>>
    %112 = tpu.memref_squeeze %111 : memref<1x!tpu.dma_semaphore, #tpu.memory_space<semaphore_mem>> -> memref<!tpu.dma_semaphore, #tpu.memory_space<semaphore_mem>>
    tpu.wait_dma2 semaphore(%112 : memref<!tpu.dma_semaphore, #tpu.memory_space<semaphore_mem>>) src(%108 : memref<1x128xf32, #tpu.memory_space<any>>) dst(%110 : memref<1x128xf32, #tpu.memory_space<vmem>>)
    %c0_i32_91 = arith.constant 0 : i32
    %c4_i32_92 = arith.constant 4 : i32
    %c4_i32_93 = arith.constant 4 : i32
    %c0_i32_94 = arith.constant 0 : i32
    %c0_i32_95 = arith.constant 0 : i32
    %113 = tpu.memref_slice %arg4[%25, %c0_i32_94, %c0_i32_95] : memref<16x1x128xf32, #tpu.memory_space<any>> -> memref<1x1x128xf32, #tpu.memory_space<any>>
    %114 = tpu.memref_squeeze %113 : memref<1x1x128xf32, #tpu.memory_space<any>> -> memref<1x128xf32, #tpu.memory_space<any>>
    %c0_i32_96 = arith.constant 0 : i32
    %c0_i32_97 = arith.constant 0 : i32
    %115 = tpu.memref_slice %arg5[%c0_i32_91, %c4_i32_92, %c0_i32_96, %c0_i32_97] : memref<1x8x1x128xf32, #tpu.memory_space<vmem>> -> memref<1x1x1x128xf32, #tpu.memory_space<vmem>>
    %116 = tpu.memref_squeeze %115 : memref<1x1x1x128xf32, #tpu.memory_space<vmem>> -> memref<1x128xf32, #tpu.memory_space<vmem>>
    %117 = tpu.memref_slice %arg6[%c4_i32_93] : memref<8x!tpu.dma_semaphore, #tpu.memory_space<semaphore_mem>> -> memref<1x!tpu.dma_semaphore, #tpu.memory_space<semaphore_mem>>
    %118 = tpu.memref_squeeze %117 : memref<1x!tpu.dma_semaphore, #tpu.memory_space<semaphore_mem>> -> memref<!tpu.dma_semaphore, #tpu.memory_space<semaphore_mem>>
    tpu.wait_dma2 semaphore(%118 : memref<!tpu.dma_semaphore, #tpu.memory_space<semaphore_mem>>) src(%114 : memref<1x128xf32, #tpu.memory_space<any>>) dst(%116 : memref<1x128xf32, #tpu.memory_space<vmem>>)
    %c0_i32_98 = arith.constant 0 : i32
    %c5_i32_99 = arith.constant 5 : i32
    %c5_i32_100 = arith.constant 5 : i32
    %c0_i32_101 = arith.constant 0 : i32
    %c0_i32_102 = arith.constant 0 : i32
    %119 = tpu.memref_slice %arg4[%30, %c0_i32_101, %c0_i32_102] : memref<16x1x128xf32, #tpu.memory_space<any>> -> memref<1x1x128xf32, #tpu.memory_space<any>>
    %120 = tpu.memref_squeeze %119 : memref<1x1x128xf32, #tpu.memory_space<any>> -> memref<1x128xf32, #tpu.memory_space<any>>
    %c0_i32_103 = arith.constant 0 : i32
    %c0_i32_104 = arith.constant 0 : i32
    %121 = tpu.memref_slice %arg5[%c0_i32_98, %c5_i32_99, %c0_i32_103, %c0_i32_104] : memref<1x8x1x128xf32, #tpu.memory_space<vmem>> -> memref<1x1x1x128xf32, #tpu.memory_space<vmem>>
    %122 = tpu.memref_squeeze %121 : memref<1x1x1x128xf32, #tpu.memory_space<vmem>> -> memref<1x128xf32, #tpu.memory_space<vmem>>
    %123 = tpu.memref_slice %arg6[%c5_i32_100] : memref<8x!tpu.dma_semaphore, #tpu.memory_space<semaphore_mem>> -> memref<1x!tpu.dma_semaphore, #tpu.memory_space<semaphore_mem>>
    %124 = tpu.memref_squeeze %123 : memref<1x!tpu.dma_semaphore, #tpu.memory_space<semaphore_mem>> -> memref<!tpu.dma_semaphore, #tpu.memory_space<semaphore_mem>>
    tpu.wait_dma2 semaphore(%124 : memref<!tpu.dma_semaphore, #tpu.memory_space<semaphore_mem>>) src(%120 : memref<1x128xf32, #tpu.memory_space<any>>) dst(%122 : memref<1x128xf32, #tpu.memory_space<vmem>>)
    %c0_i32_105 = arith.constant 0 : i32
    %c6_i32_106 = arith.constant 6 : i32
    %c6_i32_107 = arith.constant 6 : i32
    %c0_i32_108 = arith.constant 0 : i32
    %c0_i32_109 = arith.constant 0 : i32
    %125 = tpu.memref_slice %arg4[%35, %c0_i32_108, %c0_i32_109] : memref<16x1x128xf32, #tpu.memory_space<any>> -> memref<1x1x128xf32, #tpu.memory_space<any>>
    %126 = tpu.memref_squeeze %125 : memref<1x1x128xf32, #tpu.memory_space<any>> -> memref<1x128xf32, #tpu.memory_space<any>>
    %c0_i32_110 = arith.constant 0 : i32
    %c0_i32_111 = arith.constant 0 : i32
    %127 = tpu.memref_slice %arg5[%c0_i32_105, %c6_i32_106, %c0_i32_110, %c0_i32_111] : memref<1x8x1x128xf32, #tpu.memory_space<vmem>> -> memref<1x1x1x128xf32, #tpu.memory_space<vmem>>
    %128 = tpu.memref_squeeze %127 : memref<1x1x1x128xf32, #tpu.memory_space<vmem>> -> memref<1x128xf32, #tpu.memory_space<vmem>>
    %129 = tpu.memref_slice %arg6[%c6_i32_107] : memref<8x!tpu.dma_semaphore, #tpu.memory_space<semaphore_mem>> -> memref<1x!tpu.dma_semaphore, #tpu.memory_space<semaphore_mem>>
    %130 = tpu.memref_squeeze %129 : memref<1x!tpu.dma_semaphore, #tpu.memory_space<semaphore_mem>> -> memref<!tpu.dma_semaphore, #tpu.memory_space<semaphore_mem>>
    tpu.wait_dma2 semaphore(%130 : memref<!tpu.dma_semaphore, #tpu.memory_space<semaphore_mem>>) src(%126 : memref<1x128xf32, #tpu.memory_space<any>>) dst(%128 : memref<1x128xf32, #tpu.memory_space<vmem>>)
    %c0_i32_112 = arith.constant 0 : i32
    %c7_i32_113 = arith.constant 7 : i32
    %c7_i32_114 = arith.constant 7 : i32
    %c0_i32_115 = arith.constant 0 : i32
    %c0_i32_116 = arith.constant 0 : i32
    %131 = tpu.memref_slice %arg4[%40, %c0_i32_115, %c0_i32_116] : memref<16x1x128xf32, #tpu.memory_space<any>> -> memref<1x1x128xf32, #tpu.memory_space<any>>
    %132 = tpu.memref_squeeze %131 : memref<1x1x128xf32, #tpu.memory_space<any>> -> memref<1x128xf32, #tpu.memory_space<any>>
    %c0_i32_117 = arith.constant 0 : i32
    %c0_i32_118 = arith.constant 0 : i32
    %133 = tpu.memref_slice %arg5[%c0_i32_112, %c7_i32_113, %c0_i32_117, %c0_i32_118] : memref<1x8x1x128xf32, #tpu.memory_space<vmem>> -> memref<1x1x1x128xf32, #tpu.memory_space<vmem>>
    %134 = tpu.memref_squeeze %133 : memref<1x1x1x128xf32, #tpu.memory_space<vmem>> -> memref<1x128xf32, #tpu.memory_space<vmem>>
    %135 = tpu.memref_slice %arg6[%c7_i32_114] : memref<8x!tpu.dma_semaphore, #tpu.memory_space<semaphore_mem>> -> memref<1x!tpu.dma_semaphore, #tpu.memory_space<semaphore_mem>>
    %136 = tpu.memref_squeeze %135 : memref<1x!tpu.dma_semaphore, #tpu.memory_space<semaphore_mem>> -> memref<!tpu.dma_semaphore, #tpu.memory_space<semaphore_mem>>
    tpu.wait_dma2 semaphore(%136 : memref<!tpu.dma_semaphore, #tpu.memory_space<semaphore_mem>>) src(%132 : memref<1x128xf32, #tpu.memory_space<any>>) dst(%134 : memref<1x128xf32, #tpu.memory_space<vmem>>)
    return
  }
  func.func @transform_1(%arg0: i32, %arg1: i32, %arg2: i32, %arg3: memref<8xi32, #tpu.memory_space<smem>>) -> (i32, i32, i32, i32) {
    %c0_i32 = arith.constant 0 : i32
    %c0_i32_0 = arith.constant 0 : i32
    return %arg0, %arg1, %arg2, %c0_i32 : i32, i32, i32, i32
  }
}

</mosaic_0001>

<bundles_post_ra>
// kernel: tpu_custom_call.1
= control target key start
LH: loop header
LB: loop body
LE: loop exit
PB: predicated region body
PF: predicated region fallthrough
CT: control target
= control target key end

     0   :  { %s517_s9 = smov [#allocation4]   ;;  %s682_s0 = inlined_call_operand.hbm [shape: s32[8], index: 0, kind: input, shape index: {}]   ;;  %s683_s1 = inlined_call_operand.hbm [shape: f32[16,1,128], index: 1, kind: input, shape index: {}]   ;;  %s684_s2 = inlined_call_operand.hbm [shape: f32[1,8,1,128], index: 2, kind: output, shape index: {}]  }
   0x1   :  { %8 = dma.hbm_to_smem %s682_s0, 16, %s517_s9, [#allocation3] }
   0x2   :  { %497 = dma.done.wait [#allocation3], 16 }
   0x3   :  { %498 = vsyncadd [#allocation3], 4294967280 }
   0x4   :  { %10 = sfence }
   0x5   :  { %11 = vsyncpa [#allocation6], 0  ;;  %s14_s12 = sld [smem:[#allocation4]]  ;;  %s518_s13 = smov [#allocation5]  }
   0x6   :  { %s46_s14 = sshll.u32 %s518_s13, 4  ;;  %s546_s15 = sld [smem:[#allocation4 + $0x1]]  ;;  %s548_s14 = int_to_ptr.vmem [resolvable:$true] %s46_s14 }
   0x7   :  { %s519_s16 = smov [#allocation5 + $0x1]   ;;  %s550_s18 = sld [smem:[#allocation4 + $0x2]] }
   0x8   :  { %s61_s17 = sshll.u32 %s519_s16, 4  ;;  %s520_s19 = smov [#allocation5 + $0x2]   ;;  %s552_s17 = int_to_ptr.vmem [resolvable:$true] %s61_s17 }
   0x9   :  { %s76_s0 = sshll.u32 %s520_s19, 4  ;;  %s554_s20 = sld [smem:[#allocation4 + $0x3]]  ;;  %s556_s0 = int_to_ptr.vmem [resolvable:$true] %s76_s0 }
   0xa   :  { %s565_s29 = scalar_lea.hbm %s683_s1, 256 }
   0xb   :  { %s266_s21 = sshll.u32 %s14_s12, 4 }
   0xc   :  { %s38_s24 = scalar_lea.hbm %s683_s1, %s266_s21  ;;  %s267_s25 = sshll.u32 %s546_s15, 4 }
   0xd   :  { %s301_s26 = scalar_lea.hbm %s38_s24, 16  ;;  %p304_p1 = scmp.lt.s32.totalorder %s38_s24, %s683_s1 }
   0xe   :  { %p302_p0 = scmp.ne.s32.totalorder %s38_s24, %s301_s26  ;;  %p305_p2 = scmp.lt.s32.totalorder %s565_s29, %s301_s26 }
  0x10   :  { %p306_p3 = por %p305_p2, %p304_p1 }
  0x12   :  { %p307_p4 = pnand %p306_p3, %p302_p0 }
  0x14   :  { %310 = shalt.err (!%p307_p4)  }
  0x15   :  { %s311_s4 = scalar_lea.vmem %s548_s14, 16  ;;  %s574_s5 = scalar_lea.vmem %s548_s14, 128 }
  0x16   :  { %p312_p5 = scmp.ne.s32.totalorder %s548_s14, %s311_s4  ;;  %p316_p6 = scmp.lt.s32.totalorder %s548_s14, %s548_s14 }
  0x17   :  { %p317_p7 = scmp.lt.s32.totalorder %s574_s5, %s311_s4 }
  0x19   :  { %p318_p8 = por %p317_p7, %p316_p6 }
  0x1b   :  { %p319_p9 = pnand %p318_p8, %p312_p5 }
  0x1d   :  { %322 = shalt.err (!%p319_p9)  }
  0x1e   :  { %49 = dma.hbm_to_vmem [thread:$0]  %s38_s24, 16, %s548_s14, [#allocation2] }
  0x1f   :  { %s51_s8 = scalar_lea.hbm %s683_s1, %s267_s25  ;;  %s268_s9 = sshll.u32 %s550_s18, 4 }
  0x20   :  { %s323_s10 = scalar_lea.hbm %s51_s8, 16  ;;  %p326_p11 = scmp.lt.s32.totalorder %s51_s8, %s683_s1 }
  0x21   :  { %p324_p10 = scmp.ne.s32.totalorder %s51_s8, %s323_s10  ;;  %p327_p12 = scmp.lt.s32.totalorder %s565_s29, %s323_s10 }
  0x23   :  { %p328_p13 = por %p327_p12, %p326_p11 }
  0x25   :  { %p329_p0 = pnand %p328_p13, %p324_p10 }
  0x27   :  { %332 = shalt.err (!%p329_p0)  }
  0x28   :  { %s333_s13 = scalar_lea.vmem %s552_s17, 16  ;;  %p338_p2 = scmp.lt.s32.totalorder %s552_s17, %s548_s14 }
  0x29   :  { %p334_p1 = scmp.ne.s32.totalorder %s552_s17, %s333_s13  ;;  %p339_p3 = scmp.lt.s32.totalorder %s574_s5, %s333_s13 }
  0x2b   :  { %p340_p4 = por %p339_p3, %p338_p2 }
  0x2d   :  { %p341_p5 = pnand %p340_p4, %p334_p1 }
  0x2f   :  { %344 = shalt.err (!%p341_p5)  }
  0x30   :  { %64 = dma.hbm_to_vmem [thread:$0]  %s51_s8, 16, %s552_s17, [#allocation2 + $0x1] }
  0x31   :  { %s66_s18 = scalar_lea.hbm %s683_s1, %s268_s9  ;;  %s269_s19 = sshll.u32 %s554_s20, 4 }
  0x32   :  { %s345_s21 = scalar_lea.hbm %s66_s18, 16  ;;  %p348_p8 = scmp.lt.s32.totalorder %s66_s18, %s683_s1 }
  0x33   :  { %p346_p7 = scmp.ne.s32.totalorder %s66_s18, %s345_s21  ;;  %p349_p9 = scmp.lt.s32.totalorder %s565_s29, %s345_s21 }
  0x35   :  { %p350_p10 = por %p349_p9, %p348_p8 }
  0x37   :  { %p351_p11 = pnand %p350_p10, %p346_p7 }
  0x39   :  { %354 = shalt.err (!%p351_p11)  }
  0x3a   :  { %s355_s17 = scalar_lea.vmem %s556_s0, 16  ;;  %p360_p13 = scmp.lt.s32.totalorder %s556_s0, %s548_s14 }
  0x3b   :  { %p356_p12 = scmp.ne.s32.totalorder %s556_s0, %s355_s17  ;;  %p361_p0 = scmp.lt.s32.totalorder %s574_s5, %s355_s17 }
  0x3d   :  { %p362_p1 = por %p361_p0, %p360_p13 }
  0x3f   :  { %p363_p2 = pnand %p362_p1, %p356_p12 }
  0x41   :  { %366 = shalt.err (!%p363_p2)  }
  0x42   :  { %79 = dma.hbm_to_vmem [thread:$0]  %s66_s18, 16, %s556_s0, [#allocation2 + $0x2] }
  0x43   :  { %s81_s25 = scalar_lea.hbm %s683_s1, %s269_s19  ;;  %s521_s26 = smov [#allocation5 + $0x3]  }
  0x44   :  { %s91_s27 = sshll.u32 %s521_s26, 4  ;;  %s262_s28 = sld [smem:[#allocation4 + $0x4]]  ;;  %s92_s27 = int_to_ptr.vmem [resolvable:$true] %s91_s27 }
  0x45   :  { %s367_s30 = scalar_lea.hbm %s81_s25, 16  ;;  %p370_p4 = scmp.lt.s32.totalorder %s81_s25, %s683_s1 }
  0x46   :  { %p368_p3 = scmp.ne.s32.totalorder %s81_s25, %s367_s30  ;;  %p371_p5 = scmp.lt.s32.totalorder %s565_s29, %s367_s30 }
  0x48   :  { %p372_p7 = por %p371_p5, %p370_p4 }
  0x4a   :  { %p373_p8 = pnand %p372_p7, %p368_p3 }
  0x4c   :  { %376 = shalt.err (!%p373_p8)  }
  0x4d   :  { %s377_s6 = scalar_lea.vmem %s92_s27, 16  ;;  %p382_p10 = scmp.lt.s32.totalorder %s92_s27, %s548_s14 }
  0x4e   :  { %p378_p9 = scmp.ne.s32.totalorder %s92_s27, %s377_s6  ;;  %p383_p11 = scmp.lt.s32.totalorder %s574_s5, %s377_s6 }
  0x50   :  { %p384_p12 = por %p383_p11, %p382_p10 }
  0x52   :  { %p385_p13 = pnand %p384_p12, %p378_p9 }
  0x54   :  { %388 = shalt.err (!%p385_p13)  }
  0x55   :  { %94 = dma.hbm_to_vmem [thread:$0]  %s81_s25, 16, %s92_s27, [#allocation2 + $0x3] }
  0x56   :  { %s522_s0 = smov [#allocation5 + $0x4]   ;;  %s263_s8 = sld [smem:[#allocation4 + $0x5]] }
  0x57   :  { %s106_s7 = sshll.u32 %s522_s0, 4  ;;  %s523_s9 = smov [#allocation5 + $0x5]   ;;  %s107_s7 = int_to_ptr.vmem [resolvable:$true] %s106_s7 }
  0x58   :  { %s121_s10 = sshll.u32 %s523_s9, 4  ;;  %s620_s11 = sld [smem:[#allocation4 + $0x6]]  ;;  %s622_s10 = int_to_ptr.vmem [resolvable:$true] %s121_s10 }
  0x59   :  { %s270_s12 = sshll.u32 %s262_s28, 4 }
  0x5a   :  { %s96_s16 = scalar_lea.hbm %s683_s1, %s270_s12 }
  0x5b   :  { %s389_s18 = scalar_lea.hbm %s96_s16, 16  ;;  %p392_p1 = scmp.lt.s32.totalorder %s96_s16, %s683_s1 }
  0x5c   :  { %p390_p0 = scmp.ne.s32.totalorder %s96_s16, %s389_s18  ;;  %p393_p2 = scmp.lt.s32.totalorder %s565_s29, %s389_s18 }
  0x5e   :  { %p394_p3 = por %p393_p2, %p392_p1 }
  0x60   :  { %p395_p4 = pnand %p394_p3, %p390_p0 }
  0x62   :  { %398 = shalt.err (!%p395_p4)  }
  0x63   :  { %s399_s22 = scalar_lea.vmem %s107_s7, 16  ;;  %p404_p7 = scmp.lt.s32.totalorder %s107_s7, %s548_s14 }
  0x64   :  { %p400_p5 = scmp.ne.s32.totalorder %s107_s7, %s399_s22  ;;  %p405_p8 = scmp.lt.s32.totalorder %s574_s5, %s399_s22 }
  0x66   :  { %p406_p9 = por %p405_p8, %p404_p7 }
  0x68   :  { %p407_p10 = pnand %p406_p9, %p400_p5 }
  0x6a   :  { %410 = shalt.err (!%p407_p10)  }
  0x6b   :  { %109 = dma.hbm_to_vmem [thread:$0]  %s96_s16, 16, %s107_s7, [#allocation2 + $0x4] }
  0x6c   :  { %s271_s23 = sshll.u32 %s263_s8, 4  ;;  %s524_s17 = smov [#allocation5 + $0x6]  }
  0x6d   :  { %s136_s20 = sshll.u32 %s524_s17, 4  ;;  %s111_s26 = scalar_lea.hbm %s683_s1, %s271_s23  ;;  %s636_s20 = int_to_ptr.vmem [resolvable:$true] %s136_s20 }
  0x6e   :  { %s411_s27 = scalar_lea.hbm %s111_s26, 16  ;;  %p414_p12 = scmp.lt.s32.totalorder %s111_s26, %s683_s1 }
  0x6f   :  { %p412_p11 = scmp.ne.s32.totalorder %s111_s26, %s411_s27  ;;  %p415_p13 = scmp.lt.s32.totalorder %s565_s29, %s411_s27 }
  0x71   :  { %p416_p0 = por %p415_p13, %p414_p12 }
  0x73   :  { %p417_p1 = pnand %p416_p0, %p412_p11 }
  0x75   :  { %420 = shalt.err (!%p417_p1)  }
  0x76   :  { %s421_s3 = scalar_lea.vmem %s622_s10, 16  ;;  %p426_p3 = scmp.lt.s32.totalorder %s622_s10, %s548_s14 }
  0x77   :  { %p422_p2 = scmp.ne.s32.totalorder %s622_s10, %s421_s3  ;;  %p427_p4 = scmp.lt.s32.totalorder %s574_s5, %s421_s3 }
  0x79   :  { %p428_p5 = por %p427_p4, %p426_p3 }
  0x7b   :  { %p429_p7 = pnand %p428_p5, %p422_p2 }
  0x7d   :  { %432 = shalt.err (!%p429_p7)  }
  0x7e   :  { %124 = dma.hbm_to_vmem [thread:$0]  %s111_s26, 16, %s622_s10, [#allocation2 + $0x5] }
  0x7f   :  { %s272_s4 = sshll.u32 %s620_s11, 4  ;;  %s265_s6 = sld [smem:[#allocation4 + $0x7]] }
  0x80   :  { %s126_s8 = scalar_lea.hbm %s683_s1, %s272_s4 }
  0x81   :  { %s433_s9 = scalar_lea.hbm %s126_s8, 16  ;;  %p436_p9 = scmp.lt.s32.totalorder %s126_s8, %s683_s1 }
  0x82   :  { %p434_p8 = scmp.ne.s32.totalorder %s126_s8, %s433_s9  ;;  %p437_p10 = scmp.lt.s32.totalorder %s565_s29, %s433_s9 }
  0x84   :  { %p438_p11 = por %p437_p10, %p436_p9 }
  0x86   :  { %p439_p12 = pnand %p438_p11, %p434_p8 }
  0x88   :  { %442 = shalt.err (!%p439_p12)  }
  0x89   :  { %s443_s10 = scalar_lea.vmem %s636_s20, 16  ;;  %p448_p0 = scmp.lt.s32.totalorder %s636_s20, %s548_s14 }
  0x8a   :  { %p444_p13 = scmp.ne.s32.totalorder %s636_s20, %s443_s10  ;;  %p449_p1 = scmp.lt.s32.totalorder %s574_s5, %s443_s10 }
  0x8c   :  { %p450_p2 = por %p449_p1, %p448_p0 }
  0x8e   :  { %p451_p3 = pnand %p450_p2, %p444_p13 }
  0x90   :  { %454 = shalt.err (!%p451_p3)  }
  0x91   :  { %139 = dma.hbm_to_vmem [thread:$0]  %s126_s8, 16, %s636_s20, [#allocation2 + $0x6] }
  0x92   :  { %s525_s11 = smov [#allocation5 + $0x7]   ;;  %s273_s16 = sshll.u32 %s265_s6, 4 }
  0x93   :  { %s151_s15 = sshll.u32 %s525_s11, 4  ;;  %s141_s21 = scalar_lea.hbm %s683_s1, %s273_s16  ;;  %s152_s15 = int_to_ptr.vmem [resolvable:$true] %s151_s15 }
  0x94   :  { %s455_s22 = scalar_lea.hbm %s141_s21, 16  ;;  %p458_p5 = scmp.lt.s32.totalorder %s141_s21, %s683_s1 }
  0x95   :  { %p456_p4 = scmp.ne.s32.totalorder %s141_s21, %s455_s22  ;;  %p459_p7 = scmp.lt.s32.totalorder %s565_s29, %s455_s22 }
  0x97   :  { %p460_p8 = por %p459_p7, %p458_p5 }
  0x99   :  { %p461_p9 = pnand %p460_p8, %p456_p4 }
  0x9b   :  { %464 = shalt.err (!%p461_p9)  }
  0x9c   :  { %s465_s24 = scalar_lea.vmem %s152_s15, 16  ;;  %p470_p11 = scmp.lt.s32.totalorder %s152_s15, %s548_s14 }
  0x9d   :  { %p466_p10 = scmp.ne.s32.totalorder %s152_s15, %s465_s24  ;;  %p471_p12 = scmp.lt.s32.totalorder %s574_s5, %s465_s24 }
  0x9f   :  { %p472_p13 = por %p471_p12, %p470_p11 }
  0xa1   :  { %p473_p0 = pnand %p472_p13, %p466_p10 }
  0xa3   :  { %476 = shalt.err (!%p473_p0)  }
  0xa4   :  { %154 = dma.hbm_to_vmem [thread:$0]  %s141_s21, 16, %s152_s15, [#allocation2 + $0x7] }
  0xa5   :  { %499 = dma.done.wait [#allocation2], 16 }
  0xa6   :  { %500 = vsyncadd [#allocation2], 4294967280 }
  0xa7   :  { %501 = dma.done.wait [#allocation2 + $0x1], 16 }
  0xa8   :  { %502 = vsyncadd [#allocation2 + $0x1], 4294967280 }
  0xa9   :  { %503 = dma.done.wait [#allocation2 + $0x2], 16 }
  0xaa   :  { %504 = vsyncadd [#allocation2 + $0x2], 4294967280 }
  0xab   :  { %505 = dma.done.wait [#allocation2 + $0x3], 16 }
  0xac   :  { %506 = vsyncadd [#allocation2 + $0x3], 4294967280 }
  0xad   :  { %507 = dma.done.wait [#allocation2 + $0x4], 16 }
  0xae   :  { %508 = vsyncadd [#allocation2 + $0x4], 4294967280 }
  0xaf   :  { %509 = dma.done.wait [#allocation2 + $0x5], 16 }
  0xb0   :  { %510 = vsyncadd [#allocation2 + $0x5], 4294967280 }
  0xb1   :  { %511 = dma.done.wait [#allocation2 + $0x6], 16 }
  0xb2   :  { %512 = vsyncadd [#allocation2 + $0x6], 4294967280 }
  0xb3   :  { %513 = dma.done.wait [#allocation2 + $0x7], 16 }
  0xb4   :  { %514 = vsyncadd [#allocation2 + $0x7], 4294967280  ;;  %p478_p1 = scmp.ne.s32.totalorder %s548_s14, %s574_s5  ;;  %p483_p2 = scmp.lt.s32.totalorder %s574_s5, %s574_s5 }
  0xb6   :  { %p484_p3 = por %p483_p2, %p316_p6 }
  0xb8   :  { %p485_p4 = pnand %p484_p3, %p478_p1 }
  0xba   :  { %488 = shalt.err (!%p485_p4)
}
  0xbb   :  { %s526_s1 = smov 16   ;;  %s527_s29 = smov 1  }
  0xbc   :  { %183 = dma.vmem_to_hbm [thread:$0]  %s548_s14, 128, %s684_s2, [#allocation6], %s526_s1, %s526_s1, %s527_s29  }
  0xbd   :  { %515 = dma.done.wait [#allocation6], 128  }
  0xbe   :  { %516 = vsyncadd [#allocation6], 4294967168 }
  0xbf   :  { %187 = vsyncpa [#allocation6], 1 }
  0xc0   :  { %188 = vsyncmov [#allocation2] }
  0xc3   :  { %s189_s26 = vpop.sfrf %188 }
  0xc4   :  { %p274_p5 = scmp.ne.s32.totalorder %s189_s26, 0 }
  0xc6   :  { %193 = shalt.err (%p274_p5)  }
  0xc7   :  { %195 = vsyncmov [#allocation2 + $0x1] }
  0xca   :  { %s196_s5 = vpop.sfrf %195 }
  0xcb   :  { %p275_p7 = scmp.ne.s32.totalorder %s196_s5, 0 }
  0xcd   :  { %200 = shalt.err (%p275_p7)  }
  0xce   :  { %202 = vsyncmov [#allocation2 + $0x2] }
  0xd1   :  { %s203_s27 = vpop.sfrf %202 }
  0xd2   :  { %p276_p6 = scmp.ne.s32.totalorder %s203_s27, 0 }
  0xd4   :  { %207 = shalt.err (%p276_p6)  }
  0xd5   :  { %209 = vsyncmov [#allocation2 + $0x3] }
  0xd8   :  { %s210_s28 = vpop.sfrf %209 }
  0xd9   :  { %p277_p8 = scmp.ne.s32.totalorder %s210_s28, 0 }
  0xdb   :  { %214 = shalt.err (%p277_p8)  }
  0xdc   :  { %216 = vsyncmov [#allocation2 + $0x4] }
  0xdf   :  { %s217_s2 = vpop.sfrf %216 }
  0xe0   :  { %p278_p9 = scmp.ne.s32.totalorder %s217_s2, 0 }
  0xe2   :  { %221 = shalt.err (%p278_p9)  }
  0xe3   :  { %223 = vsyncmov [#allocation2 + $0x5] }
  0xe6   :  { %s224_s14 = vpop.sfrf %223 }
  0xe7   :  { %p279_p10 = scmp.ne.s32.totalorder %s224_s14, 0 }
  0xe9   :  { %228 = shalt.err (%p279_p10)  }
  0xea   :  { %230 = vsyncmov [#allocation2 + $0x6] }
  0xed   :  { %s231_s30 = vpop.sfrf %230 }
  0xee   :  { %p280_p11 = scmp.ne.s32.totalorder %s231_s30, 0 }
  0xf0   :  { %235 = shalt.err (%p280_p11)  }
  0xf1   :  { %237 = vsyncmov [#allocation2 + $0x7] }
  0xf4   :  { %s238_s3 = vpop.sfrf %237 }
  0xf5   :  { %p281_p12 = scmp.ne.s32.totalorder %s238_s3, 0 }
  0xf7   :  { %242 = shalt.err (%p281_p12)  }

</bundles_post_ra>
